<compile_context>
chip_gen: v6e
topology: v6e:2x2x1
jax: 0.10.0
libtpu: 0.0.40
codegen_flags: <defaults>
</compile_context>

<pallas_src>
import functools

import jax
import jax.numpy as jnp
import numpy as np
from jax.experimental import pallas as pl
from jax.experimental.pallas import tpu as pltpu


# ----------------------------- Pallas kernels ---------------------------------


def _rnn_cell_kernel(x_ref, h_ref, wx_ref, wh_ref, b_ref, out_ref, hid_ref, *,
                     hidden_size):
    """Single ExRNN step with fused projections: 2 matmuls, 5 inputs."""
    H = hidden_size
    x = x_ref[...]                                    # (B, Din)
    h = h_ref[...]                                    # (B, H)
    # cat(x, h) @ [W_h.T | W_o.T] + [b_h | b_o]  ->  (B, H + O) pre-activation.
    pre = (jnp.dot(x, wx_ref[...], preferred_element_type=jnp.float32)
           + jnp.dot(h, wh_ref[...], preferred_element_type=jnp.float32)
           + b_ref[...])
    # torch.sigmoid on the hidden lanes; output lanes are returned unactivated.
    hid_ref[...] = pl.reciprocal(1.0 + jnp.exp(-pre[:, :H]), approx=False)
    out_ref[...] = pre[:, H:]


def _rnn_seq_kernel(x_ref, h0_ref, wx_ref, wh_ref, b_ref,
                    out_ref, hT_ref, h_scratch, *, hidden_size):
    """T ExRNN steps in one pallas_call.

    grid=(T,) "arbitrary"; weights stay VMEM-resident (constant index_map);
    the hidden state is carried across grid steps in VMEM scratch and only the
    final hidden state is written back to HBM.
    """
    H = hidden_size
    t = pl.program_id(0)

    @pl.when(t == 0)
    def _():
        h_scratch[...] = h0_ref[...]

    x = x_ref[0]                                      # (B, Din) for timestep t
    h = h_scratch[...]                                # (B, H)
    pre = (jnp.dot(x, wx_ref[...], preferred_element_type=jnp.float32)
           + jnp.dot(h, wh_ref[...], preferred_element_type=jnp.float32)
           + b_ref[...])
    new_h = pl.reciprocal(1.0 + jnp.exp(-pre[:, :H]), approx=False)
    h_scratch[...] = new_h
    out_ref[0] = pre[:, H:]                           # per-step output

    @pl.when(t == pl.num_programs(0) - 1)
    def _():
        hT_ref[...] = new_h                           # final hidden, written once


# ------------------------------- wrappers --------------------------------------


@jax.jit
def ex_rnn_forward(x, hidden_state, wx, wh, b):
    """Single step — exact equivalent of ExRNN.forward(x, hidden_state)."""
    B = x.shape[0]
    H = wh.shape[0]
    O = wx.shape[1] - H
    vmem = pl.BlockSpec(memory_space=pltpu.MemorySpace.VMEM)
    # NOTE: input_output_aliases={1: 1} could donate the hidden buffer when this
    # cell is scanned externally; the in-kernel sequence version below makes that
    # unnecessary (hidden lives in VMEM scratch).
    out, hid = pl.pallas_call(
        functools.partial(_rnn_cell_kernel, hidden_size=H),
        out_shape=(jax.ShapeDtypeStruct((B, O), jnp.float32),   # output
                   jax.ShapeDtypeStruct((B, H), jnp.float32)),  # new hidden
        in_specs=[vmem] * 5,
        out_specs=(vmem, vmem),
    )(x, hidden_state, wx, wh, b)
    return out, hid


@jax.jit
def ex_rnn_forward_seq(x_seq, h0, wx, wh, b):
    """Apply the ExRNN cell over a (T, B, Din) sequence in ONE pallas_call."""
    T, B, Din = x_seq.shape
    H = wh.shape[0]
    HO = wx.shape[1]
    O = HO - H
    out_seq, hT = pl.pallas_call(
        functools.partial(_rnn_seq_kernel, hidden_size=H),
        out_shape=(jax.ShapeDtypeStruct((T, B, O), jnp.float32),  # all outputs
                   jax.ShapeDtypeStruct((B, H), jnp.float32)),    # final hidden
        grid=(T,),
        in_specs=[
            pl.BlockSpec((1, B, Din), lambda t: (t, 0, 0)),   # x_t streamed per step
            pl.BlockSpec((B, H),    lambda t: (0, 0)),        # h0 resident
            pl.BlockSpec((Din, HO), lambda t: (0, 0)),        # weights resident
            pl.BlockSpec((H, HO),   lambda t: (0, 0)),
            pl.BlockSpec((1, HO),   lambda t: (0, 0)),
        ],
        out_specs=(
            pl.BlockSpec((1, B, O), lambda t: (t, 0, 0)),
            pl.BlockSpec((B, H),    lambda t: (0, 0)),
        ),
        scratch_shapes=[pltpu.VMEM((B, H), jnp.float32)],     # carried hidden
        compiler_params=pltpu.CompilerParams(
            dimension_semantics=("arbitrary",)),              # sequential recurrence
    )(x_seq, h0, wx, wh, b)
    return out_seq, hT


# --------------------------- parameters & reference ----------------------------


def init_params(key, input_size, hidden_size, output_size):
    """PyTorch nn.Linear-style init for in2hidden / in2output (deterministic)."""
    fan_in = input_size + hidden_size
    bound = 1.0 / np.sqrt(fan_in)
    k1, k2, k3, k4 = jax.random.split(key, 4)
    return {
        "W_h": jax.random.uniform(k1, (hidden_size, fan_in), jnp.float32, -bound, bound),
        "b_h": jax.random.uniform(k2, (hidden_size,), jnp.float32, -bound, bound),
        "W_o": jax.random.uniform(k3, (output_size, fan_in), jnp.float32, -bound, bound),
        "b_o": jax.random.uniform(k4, (output_size,), jnp.float32, -bound, bound),
    }


def prepare_params(params, input_size):
    """One-time weight prep (hoisted out of the per-call path).

    cat(x, h) @ W.T  ==  x @ W[:, :Din].T + h @ W[:, Din:].T, and the hidden/
    output projections are fused column-wise:  [W_h.T | W_o.T].
    """
    Din = input_size
    w_full = jnp.concatenate([params["W_h"].T, params["W_o"].T], axis=1)  # (Din+H, H+O)
    wx = w_full[:Din]                                                     # (Din, H+O)
    wh = w_full[Din:]                                                     # (H,   H+O)
    b = jnp.concatenate([params["b_h"], params["b_o"]]).reshape(1, -1)    # (1,   H+O)
    return jax.block_until_ready((wx, wh, b))


def reference_forward(x, hidden_state, params):
    """Pure-JAX transliteration of ExRNN.forward (verification)."""
    combined = jnp.concatenate([x, hidden_state], axis=1)
    hidden = jax.nn.sigmoid(combined @ params["W_h"].T + params["b_h"])
    output = combined @ params["W_o"].T + params["b_o"]
    return output, hidden


def reference_forward_seq(x_seq, h0, params):
    def step(h, x):
        out, h_new = reference_forward(x, h, params)
        return h_new, out
    hT, outs = jax.lax.scan(step, h0, x_seq)
    return outs, hT


# ------------------------------------ main --------------------------------------


if __name__ == "__main__":
    input_size, hidden_size, output_size = 32, 64, 2
    B, T = 2, 8

    key = jax.random.PRNGKey(0)
    k_p, k_x, k_h, k_s = jax.random.split(key, 4)
    params = init_params(k_p, input_size, hidden_size, output_size)
    wx, wh, b = prepare_params(params, input_size)

    # --- single ExRNN.forward step (module semantics) ---
    x = jax.random.normal(k_x, (B, input_size), jnp.float32)
    # Random hidden state so the recurrent-weight path is exercised.
    hidden_state = jax.random.normal(k_h, (B, hidden_size), jnp.float32)

    out, hid = ex_rnn_forward(x, hidden_state, wx, wh, b)
    jax.block_until_ready((out, hid))
    out_ref, hid_ref = reference_forward(x, hidden_state, params)
    np.testing.assert_allclose(np.asarray(out), np.asarray(out_ref), rtol=1e-5, atol=1e-5)
    np.testing.assert_allclose(np.asarray(hid), np.asarray(hid_ref), rtol=1e-5, atol=1e-5)

    # --- T-step sequence in one pallas_call (hidden carried in VMEM scratch) ---
    x_seq = jax.random.normal(k_s, (T, B, input_size), jnp.float32)
    h0 = jnp.zeros((B, hidden_size), jnp.float32)        # ExRNN.init_hidden(bs)

    out_seq, hT = ex_rnn_forward_seq(x_seq, h0, wx, wh, b)
    jax.block_until_ready((out_seq, hT))
    out_seq_ref, hT_ref = reference_forward_seq(x_seq, h0, params)
    np.testing.assert_allclose(np.asarray(out_seq), np.asarray(out_seq_ref),
                               rtol=1e-5, atol=1e-5)
    np.testing.assert_allclose(np.asarray(hT), np.asarray(hT_ref),
                               rtol=1e-5, atol=1e-5)

    print("KERNEL_OK")
</pallas_src>

<mosaic_0001>
module attributes {stable_mosaic.version = 11 : i64} {
  func.func @_rnn_cell_kernel(%arg0: memref<2x32xf32, #tpu.memory_space<vmem>>, %arg1: memref<2x64xf32, #tpu.memory_space<vmem>>, %arg2: memref<32x66xf32, #tpu.memory_space<vmem>>, %arg3: memref<64x66xf32, #tpu.memory_space<vmem>>, %arg4: memref<1x66xf32, #tpu.memory_space<vmem>>, %arg5: memref<2x2xf32, #tpu.memory_space<vmem>>, %arg6: memref<2x64xf32, #tpu.memory_space<vmem>>) attributes {dimension_semantics = [], scalar_prefetch = 0 : i64, scratch_operands = 0 : i64, tpu.core_type = #tpu.core_type<tc>} {
    %c0 = arith.constant 0 : index
    %c0_0 = arith.constant 0 : index
    %0 = vector.load %arg0[%c0, %c0_0] : memref<2x32xf32, #tpu.memory_space<vmem>>, vector<2x32xf32>
    %c0_1 = arith.constant 0 : index
    %c0_2 = arith.constant 0 : index
    %1 = vector.load %arg1[%c0_1, %c0_2] : memref<2x64xf32, #tpu.memory_space<vmem>>, vector<2x64xf32>
    %c0_3 = arith.constant 0 : index
    %c0_4 = arith.constant 0 : index
    %2 = vector.load %arg2[%c0_3, %c0_4] : memref<32x66xf32, #tpu.memory_space<vmem>>, vector<32x66xf32>
    %cst = arith.constant dense<0.000000e+00> : vector<2x66xf32>
    %3 = tpu.matmul %0, %2, %cst {dimension_numbers = #tpu.dot_dimension_numbers<[1], [0], [0], [1], [0, 0, 1, 1], [], []>} : vector<2x32xf32>, vector<32x66xf32>, vector<2x66xf32> -> vector<2x66xf32>
    %c0_5 = arith.constant 0 : index
    %c0_6 = arith.constant 0 : index
    %4 = vector.load %arg3[%c0_5, %c0_6] : memref<64x66xf32, #tpu.memory_space<vmem>>, vector<64x66xf32>
    %cst_7 = arith.constant dense<0.000000e+00> : vector<2x66xf32>
    %5 = tpu.matmul %1, %4, %cst_7 {dimension_numbers = #tpu.dot_dimension_numbers<[1], [0], [0], [1], [0, 0, 1, 1], [], []>} : vector<2x64xf32>, vector<64x66xf32>, vector<2x66xf32> -> vector<2x66xf32>
    %6 = arith.addf %3, %5 : vector<2x66xf32>
    %c0_8 = arith.constant 0 : index
    %c0_9 = arith.constant 0 : index
    %7 = vector.load %arg4[%c0_8, %c0_9] : memref<1x66xf32, #tpu.memory_space<vmem>>, vector<1x66xf32>
    %8 = vector.broadcast %7 : vector<1x66xf32> to vector<2x66xf32>
    %9 = arith.addf %6, %8 : vector<2x66xf32>
    %10 = vector.extract_strided_slice %9 {offsets = [0, 0], sizes = [2, 64], strides = [1, 1]} : vector<2x66xf32> to vector<2x64xf32>
    %cst_10 = arith.constant 0.000000e+00 : f32
    %11 = vector.broadcast %cst_10 : f32 to vector<2x64xf32>
    %12 = arith.subf %11, %10 : vector<2x64xf32>
    %13 = math.exp %12 : vector<2x64xf32>
    %cst_11 = arith.constant 1.000000e+00 : f32
    %14 = vector.broadcast %cst_11 : f32 to vector<2x64xf32>
    %15 = arith.addf %14, %13 : vector<2x64xf32>
    %16 = tpu.reciprocal %15 : vector<2x64xf32> -> vector<2x64xf32>
    %c0_12 = arith.constant 0 : index
    %c0_13 = arith.constant 0 : index
    %17 = vector.load %arg6[%c0_12, %c0_13] : memref<2x64xf32, #tpu.memory_space<vmem>>, vector<2x64xf32>
    tpu.vector_store %arg6[%c0_12, %c0_13], %16 {strides = array<i32>} : memref<2x64xf32, #tpu.memory_space<vmem>>, vector<2x64xf32>,
    %18 = vector.extract_strided_slice %9 {offsets = [0, 64], sizes = [2, 2], strides = [1, 1]} : vector<2x66xf32> to vector<2x2xf32>
    %c0_14 = arith.constant 0 : index
    %c0_15 = arith.constant 0 : index
    %19 = vector.load %arg5[%c0_14, %c0_15] : memref<2x2xf32, #tpu.memory_space<vmem>>, vector<2x2xf32>
    tpu.vector_store %arg5[%c0_14, %c0_15], %18 {strides = array<i32>} : memref<2x2xf32, #tpu.memory_space<vmem>>, vector<2x2xf32>,
    return
  }
}

</mosaic_0001>

<bundles_post_ra>
// kernel: ex_rnn_forward.1
= control target key start
LH: loop header
LB: loop body
LE: loop exit
PB: predicated region body
PF: predicated region fallthrough
CT: control target
= control target key end

     0   :  { %12 = vsyncpa [#allocation3], 0  ;;  %s548_s0 = inlined_call_operand.hbm [shape: f32[2,32], index: 0, kind: input, shape index: {}]   ;;  %s549_s1 = inlined_call_operand.hbm [shape: f32[2,64], index: 1, kind: input, shape index: {}]   ;;  %s550_s2 = inlined_call_operand.hbm [shape: f32[32,66], index: 2, kind: input, shape index: {}]   ;;  %s551_s3 = inlined_call_operand.hbm [shape: f32[64,66], index: 3, kind: input, shape index: {}]   ;;  %s552_s4 = inlined_call_operand.vmem [shape: f32[1,66], index: 4, kind: input, shape index: {}]   ;;  %s553_s5 = inlined_call_operand.hbm [shape: f32[2,2], index: 5, kind: output, shape index: {0}]   ;;  %s554_s6 = inlined_call_operand.hbm [shape: f32[2,64], index: 6, kind: output, shape index: {1}]  }
   0x1   :  { %13 = vsyncpa [#allocation6], 0 }
   0x2   :  { %14 = vsyncpa [#allocation9], 0 }
   0x3   :  { %15 = vsyncpa [#allocation4], 0 }
   0x4   :  { %16 = vsyncpa [#allocation12], 0  ;;  %s481_s21 = smov [#allocation5]   ;;  %s482_s23 = smov [#allocation2]  }
   0x5   :  { %s33_s22 = sshll.u32 %s481_s21, 4  ;;  %s23_s24 = sshll.u32 %s482_s23, 4  ;;  %s34_s22 = int_to_ptr.vmem [resolvable:$true] %s33_s22  ;;  %s24_s24 = int_to_ptr.vmem [resolvable:$true] %s23_s24 }
   0x6   :  { %s359_s25 = scalar_lea.vmem %s34_s22, 32  ;;  %p364_p1 = scmp.lt.s32.totalorder %s34_s22, %s34_s22 }
   0x7   :  { %p360_p0 = scmp.ne.s32.totalorder %s34_s22, %s359_s25  ;;  %p365_p2 = scmp.lt.s32.totalorder %s359_s25, %s359_s25 }
   0x9   :  { %p366_p3 = por %p365_p2, %p364_p1 }
   0xb   :  { %p367_p4 = pnand %p366_p3, %p360_p0 }
   0xd   :  { %370 = shalt.err (!%p367_p4)
}
   0xe   :  { %36 = dma.hbm_to_vmem [thread:$0]  %s549_s1, 32, %s34_s22, [#allocation6]  }
   0xf   :  { %s379_s28 = scalar_lea.vmem %s24_s24, 32  ;;  %p384_p6 = scmp.lt.s32.totalorder %s24_s24, %s24_s24 }
  0x10   :  { %p380_p5 = scmp.ne.s32.totalorder %s24_s24, %s379_s28  ;;  %p385_p7 = scmp.lt.s32.totalorder %s379_s28, %s379_s28 }
  0x12   :  { %p386_p8 = por %p385_p7, %p384_p6 }
  0x14   :  { %p387_p9 = pnand %p386_p8, %p380_p5 }
  0x16   :  { %390 = shalt.err (!%p387_p9)
}
  0x17   :  { %26 = dma.hbm_to_vmem [thread:$0]  %s548_s0, 32, %s24_s24, [#allocation3]  }
  0x18   :  { %s483_s7 = smov [#allocation7]  }
  0x19   :  { %s42_s8 = sshll.u32 %s483_s7, 4  ;;  %s43_s8 = int_to_ptr.vmem [resolvable:$true] %s42_s8 }
  0x1a   :  { %s399_s9 = scalar_lea.vmem %s43_s8, 512  ;;  %p404_p11 = scmp.lt.s32.totalorder %s43_s8, %s43_s8 }
  0x1b   :  { %p400_p10 = scmp.ne.s32.totalorder %s43_s8, %s399_s9  ;;  %p405_p12 = scmp.lt.s32.totalorder %s399_s9, %s399_s9 }
  0x1d   :  { %p406_p13 = por %p405_p12, %p404_p11 }
  0x1f   :  { %p407_p0 = pnand %p406_p13, %p400_p10 }
  0x21   :  { %410 = shalt.err (!%p407_p0)
}
  0x22   :  { %s484_s1 = smov 128   ;;  %s485_s10 = smov 8  }
  0x23   :  { %48 = dma.hbm_to_vmem [thread:$0]  %s550_s2, 512, %s43_s8, [#allocation6], %s484_s1, %s484_s1, %s485_s10  }
  0x24   :  { %s486_s13 = smov [#allocation8]  }
  0x25   :  { %s54_s14 = sshll.u32 %s486_s13, 4  ;;  %s55_s14 = int_to_ptr.vmem [resolvable:$true] %s54_s14 }
  0x26   :  { %s419_s0 = scalar_lea.vmem %s55_s14, 1024  ;;  %p424_p2 = scmp.lt.s32.totalorder %s55_s14, %s55_s14 }
  0x27   :  { %p420_p1 = scmp.ne.s32.totalorder %s55_s14, %s419_s0  ;;  %p425_p3 = scmp.lt.s32.totalorder %s419_s0, %s419_s0 }
  0x29   :  { %p426_p4 = por %p425_p3, %p424_p2 }
  0x2b   :  { %p427_p5 = pnand %p426_p4, %p420_p1 }
  0x2d   :  { %430 = shalt.err (!%p427_p5)
}
  0x2e   :  { %60 = dma.hbm_to_vmem [thread:$0]  %s551_s3, 1024, %s55_s14, [#allocation9], %s484_s1, %s484_s1, %s485_s10  }
  0x2f   :  { %471 = dma.done.wait [#allocation3], 32  }
  0x30   :  { %472 = vsyncadd [#allocation3], 4294967264 }
  0x31   :  { %473 = dma.done.wait [#allocation6], 544  }
  0x32   :  { %474 = vsyncadd [#allocation6], 4294966752 }
  0x33   :  { %475 = dma.done.wait [#allocation9], 1024  }
  0x34   :  { %476 = vsyncadd [#allocation9], 4294966272  ;;  %v487_v0 = vmov 0.0   ;;  %vm488_vm0 = vmmov 0   ;;  %v88_v1 = vld [vmem:[#allocation8 + $0x38] sm:$0xff]  ;;  %v87_v2 = vld [vmem:[#allocation8 + $0x30] sm:$0xff] }
  0x35   :  { %306 = vmatprep.subr.mxu0 %v487_v0  ;;  %325 = vmatprep.subr.mxu1 %v487_v0  ;;  %v80_v3 = vld [vmem:[#allocation7 + $0x18] sm:$0xff]  ;;  %v86_v4 = vld [vmem:[#allocation8 + $0x28] sm:$0xff]  ;;  %v79_v5 = vld [vmem:[#allocation7 + $0x10] sm:$0xff]  ;;  %vm163_vm1 = vcmask 261120   ;;  %vm89_vm2 = vcmask 523264   ;;  %s489_s17 = smov 64  }
  0x36   :  { %333 = vmatprep.mubr.msk.f32.mxu1 %vm488_vm0, %v487_v0  ;;  %322 = vmatprep.mubr.msk.f32.mxu0 %vm488_vm0, %v487_v0  ;;  %v78_v6 = vld [vmem:[#allocation7 + $0x8] sm:$0xff]  ;;  %v85_v7 = vld [vmem:[#allocation8 + $0x20] sm:$0xff]  ;;  %v84_v9 = vld [vmem:[#allocation8 + $0x18] sm:$0xff]  ;;  %s490_s18 = smov [#allocation11]   ;;  %vm250_vm3 = vcmask 517120  }
  0x37   :  { %307 = vmatpush3.msra.mxu0 %v88_v1  ;;  %326 = vmatpush3.msra.mxu1 %v80_v3  ;;  %v77_v8 = vld [vmem:[#allocation7] sm:$0xff]  ;;  %v75_v10 = vld [vmem:[#allocation2] sm:$0x3]  ;;  %v83_v11 = vld [vmem:[#allocation8 + $0x10] sm:$0xff]  ;;  %s274_s19 = sshll.u32 %s490_s18, 4  ;;  %s275_s19 = int_to_ptr.vmem [resolvable:$true] %s274_s19 }
  0x38   :  { %308 = vmatprep.subr.mxu0 %v487_v0  ;;  %327 = vmatprep.subr.mxu1 %v487_v0  ;;  %v82_v12 = vld [vmem:[#allocation8 + $0x8] sm:$0xff]  ;;  %v81_v13 = vld [vmem:[#allocation8] sm:$0xff]  ;;  %v76_v14 = vld [vmem:[#allocation5] sm:$0x3]  ;;  %s431_s20 = scalar_lea.vmem %s275_s19, 32  ;;  %p436_p7 = scmp.lt.s32.totalorder %s275_s19, %s275_s19 }
  0x39   :  { %309 = vmatpush3.msra.mxu0 %v87_v2  ;;  %328 = vmatpush3.msra.mxu1 %v79_v5  ;;  %v291_v18 = vld [vmem:[%s552_s4] ss:$0 sm:$0xff]  ;;  %p432_p6 = scmp.ne.s32.totalorder %s275_s19, %s431_s20  ;;  %p437_p8 = scmp.lt.s32.totalorder %s431_s20, %s431_s20 }
  0x3a   :  { %310 = vmatprep.subr.mxu0 %v487_v0  ;;  %329 = vmatprep.subr.mxu1 %v487_v0 }
  0x3b   :  { %311 = vmatpush3.msra.mxu0 %v86_v4  ;;  %330 = vmatpush3.msra.mxu1 %v78_v6  ;;  %p438_p9 = por %p437_p8, %p436_p7 }
  0x3c   :  { %312 = vmatprep.subr.mxu0 %v487_v0  ;;  %331 = vmatprep.subr.mxu1 %v487_v0 }
  0x3d   :  { %313 = vmatpush3.msra.mxu0 %v85_v7  ;;  %332 = vmatpush3.msra.mxu1 %v77_v8  ;;  %p439_p10 = pnand %p438_p9, %p432_p6 }
  0x3e   :  { %314 = vmatprep.subr.mxu0 %v487_v0  ;;  %334 = vmatmul.mubr.msk.f32.vlgmr.msra.gmra.mxu1 %vm163_vm1, %v75_v10 }
  0x3f   :  { %315 = vmatpush3.msra.mxu0 %v84_v9 }
  0x40   :  { %316 = vmatprep.subr.mxu0 %v487_v0 }
  0x41   :  { %317 = vmatpush3.msra.mxu0 %v83_v11 }
  0x42   :  { %318 = vmatprep.subr.mxu0 %v487_v0 }
  0x43   :  { %319 = vmatpush3.msra.mxu0 %v82_v12 }
  0x44   :  { %320 = vmatprep.subr.mxu0 %v487_v0 }
  0x45   :  { %321 = vmatpush3.msra.mxu0 %v81_v13 }
  0x46   :  { %323 = vmatmul.mubr.msk.f32.vlgmr.msra.gmra.mxu0 %vm89_vm2, %v76_v14 }
  0xfe   :  { %v233_v15 = vpop.f32.mrf.mxu1 }
 0x100   :  { %v335_v16 = vpop.f32.mrf.mxu1 }
 0x106   :  { %v159_v17 = vpop.f32.mrf.mxu0 }
 0x107   :  { %v234_v19 = vadd.f32 %v233_v15, %v159_v17 }
 0x108   :  { %v324_v20 = vpop.f32.mrf.mxu0 }
 0x109   :  { %v244_v21 = vadd.f32 %v291_v18, %v234_v19 }
 0x10b   :  { %v245_v22 = vsub.f32 0.0, %v244_v21  ;;  %253 = vrot.lane.b32.xlu0 %v244_v21, %s489_s17 }
 0x10d   :  { %v246_v23 = vmul.f32 1.442695, %v245_v22 }
 0x10f   :  { %347 = vpow2.f32 %v246_v23 }
 0x11c   :  { %v348_v24 = vpop.eup %347 }
 0x11d   :  { %v248_v25 = vadd.f32 1.0, %v348_v24 }
 0x11f   :  { %349 = vrcp.f32 %v248_v25 }
 0x12c   :  { %v350_v26 = vpop.eup %349 }
 0x12d   :  { %251 = vst.msk [vmem:[#allocation11] sm:$0x3] %vm250_vm3, %v350_v26 }
 0x12e   :  { %442 = shalt.err (!%p439_p10)
}
 0x12f   :  { %277 = dma.vmem_to_hbm [thread:$0]  %s275_s19, 32, %s554_s6, [#allocation12]   ;;  %vm256_vm4 = vcmask 9216  }
 0x130   :  { %s491_s22 = smov [#allocation10]  }
 0x131   :  { %s264_s23 = sshll.u32 %s491_s22, 4  ;;  %s265_s23 = int_to_ptr.vmem [resolvable:$true] %s264_s23 }
 0x132   :  { %s451_s24 = scalar_lea.vmem %s265_s23, 32  ;;  %p456_p12 = scmp.lt.s32.totalorder %s265_s23, %s265_s23 }
 0x133   :  { %p452_p11 = scmp.ne.s32.totalorder %s265_s23, %s451_s24  ;;  %p457_p13 = scmp.lt.s32.totalorder %s451_s24, %s451_s24 }
 0x135   :  { %p458_p0 = por %p457_p13, %p456_p12 }
 0x137   :  { %p459_p1 = pnand %p458_p0, %p452_p11 }
 0x17d   :  { %v254_v27 = vpop.permute.xlu0 %253 }
 0x17e   :  { %257 = vst.msk [vmem:[#allocation10] sm:$0x3] %vm256_vm4, %v254_v27 }
 0x17f   :  { %462 = shalt.err (!%p459_p1)
}
 0x180   :  { %267 = dma.vmem_to_hbm [thread:$0]  %s265_s23, 32, %s553_s5, [#allocation4]  }
 0x181   :  { %477 = dma.done.wait [#allocation4], 32  }
 0x182   :  { %478 = vsyncadd [#allocation4], 4294967264 }
 0x183   :  { %479 = dma.done.wait [#allocation12], 32  }
 0x184   :  { %480 = vsyncadd [#allocation12], 4294967264 }
 0x185   :  { %284 = vsyncpa [#allocation3], 1 }
 0x186   :  { %285 = vsyncpa [#allocation6], 1 }
 0x187   :  { %286 = vsyncpa [#allocation9], 1 }
 0x188   :  { %287 = vsyncpa [#allocation4], 1 }
 0x189   :  { %288 = vsyncpa [#allocation12], 1 }

</bundles_post_ra>
